<compile_context>
chip_gen: v5e
topology: v5e:2x2
jax: 0.10.0
libtpu: 0.0.40
codegen_flags: <defaults>
</compile_context>

<pallas_src>
import functools

import jax
import jax.numpy as jnp
from jax import lax
from jax.experimental import pallas as pl
from jax.experimental.pallas import tpu as pltpu

_LANES = 128
_ROW_BLOCK = 1024  # rows per grid step -> (1024, 128) f32 = 512 KiB per input block


def _pitch_yaw_loss_kernel(n_ref, y_ref, y_hat_ref, out_ref, acc_abs, acc_sq,
                           *, need_mask: bool):
    """Per-block: accumulate sum|d| and sum d^2 into (8,128) f32 partials."""
    i = pl.program_id(0)
    rb = y_ref.shape[0]  # static block row count

    @pl.when(i == 0)
    def _init():
        acc_abs[...] = jnp.zeros_like(acc_abs)
        acc_sq[...] = jnp.zeros_like(acc_sq)

    # Upcast in-kernel (keeps HBM traffic at native dtype width); math in f32.
    d = y_ref[...].astype(jnp.float32) - y_hat_ref[...].astype(jnp.float32)

    if need_mask:
        # Mask wrapper zero-pad lanes and Pallas partial-edge-block garbage.
        row = lax.broadcasted_iota(jnp.int32, (rb, _LANES), 0)
        lane = lax.broadcasted_iota(jnp.int32, (rb, _LANES), 1)
        gidx = (i * rb + row) * _LANES + lane
        d = jnp.where(gidx < n_ref[0], d, 0.0)

    ad = jnp.abs(d)
    sq = d * d  # |d|**2 == d*d, abs is redundant on the l2 path

    if rb % 8 == 0:
        # Layout-preserving reshape: (rb,128) -> (rb//8, 8, 128) vreg slices.
        # Leading-axis sum = pure VPU adds; XLU stays out of the hot loop.
        acc_abs[...] += jnp.sum(ad.reshape(rb // 8, 8, _LANES), axis=0)
        acc_sq[...] += jnp.sum(sq.reshape(rb // 8, 8, _LANES), axis=0)
    else:
        # Tiny single-block ragged case (rows < 8*k): accumulate into row 0.
        acc_abs[0:1, :] = acc_abs[0:1, :] + jnp.sum(ad, axis=0, keepdims=True)
        acc_sq[0:1, :] = acc_sq[0:1, :] + jnp.sum(sq, axis=0, keepdims=True)

    @pl.when(i == pl.num_programs(0) - 1)
    def _finalize():
        denom = n_ref[0].astype(jnp.float32)
        out_ref[0] = jnp.sum(acc_abs[...] / denom)  # l1: sum|d| / (B*D)
        out_ref[1] = jnp.sum(acc_sq[...] / denom)   # l2: sum d^2 / (B*D)


@jax.jit
def pitch_yaw_losses(y, y_hat):
    """Fused Pallas kernel: returns (l1_loss, l2_loss) f32 scalars in one launch."""
    if y.shape != y_hat.shape:
        raise ValueError(f"shape mismatch: {y.shape} vs {y_hat.shape}")
    n = int(y.size)

    # Flatten row-major (free view); pad < 128 elements only if needed so the
    # lane-dense (rows, 128) reshape is valid.  Padded / garbage elements are
    # masked inside the kernel, so the divisor stays the original B*D.
    fy = y.reshape(-1)
    fyh = y_hat.reshape(-1)
    rem = (-n) % _LANES
    if rem:
        fy = jnp.pad(fy, (0, rem))
        fyh = jnp.pad(fyh, (0, rem))
    rows = (n + rem) // _LANES
    y2 = fy.reshape(rows, _LANES)
    yh2 = fyh.reshape(rows, _LANES)

    if rows <= _ROW_BLOCK:
        rb, nblocks = rows, 1          # single block == full array dim (always legal)
    else:
        rb, nblocks = _ROW_BLOCK, pl.cdiv(rows, _ROW_BLOCK)
    need_mask = (rem != 0) or (rows % rb != 0)

    meta = jnp.array([n], dtype=jnp.int32)  # element count -> SMEM scalar prefetch
    kernel = functools.partial(_pitch_yaw_loss_kernel, need_mask=need_mask)
    bytes_in = n * (jnp.dtype(y.dtype).itemsize + jnp.dtype(y_hat.dtype).itemsize)

    out = pl.pallas_call(
        kernel,
        out_shape=jax.ShapeDtypeStruct((2,), jnp.float32),
        grid_spec=pltpu.PrefetchScalarGridSpec(
            num_scalar_prefetch=1,
            grid=(nblocks,),
            in_specs=[
                pl.BlockSpec((rb, _LANES), lambda i, n_ref: (i, 0)),
                pl.BlockSpec((rb, _LANES), lambda i, n_ref: (i, 0)),
            ],
            out_specs=pl.BlockSpec(memory_space=pltpu.MemorySpace.SMEM),
            scratch_shapes=[
                pltpu.VMEM((8, _LANES), jnp.float32),   # running sum |d|
                pltpu.VMEM((8, _LANES), jnp.float32),   # running sum d^2
            ],
        ),
        compiler_params=pltpu.CompilerParams(
            dimension_semantics=("arbitrary",)),
        cost_estimate=pl.CostEstimate(
            flops=5 * n, transcendentals=0, bytes_accessed=bytes_in + 8),
    )(meta, y2, yh2)
    return out[0], out[1]


@functools.partial(jax.jit, static_argnames=("loss_type",))
def pitch_yaw_loss(y, y_hat, loss_type: str = "l1"):
    """PitchYawLoss.forward (weight/average are ignored by the reference)."""
    l1, l2 = pitch_yaw_losses(y, y_hat)
    if loss_type == "l1":
        return l1
    if loss_type == "l2":
        return l2
    raise NotImplementedError(f"loss_type={loss_type}")


def _reference(y, y_hat, loss_type="l1"):
    d = jnp.abs(y.astype(jnp.float32) - y_hat.astype(jnp.float32))
    if loss_type == "l2":
        d = d ** 2
    return jnp.mean(jnp.mean(d, axis=1), axis=0)


if __name__ == "__main__":
    key = jax.random.PRNGKey(0)
    k1, k2, k3, k4 = jax.random.split(key, 4)

    # Module-typical small shape: batch=8 samples, 2 gaze angles (pitch, yaw).
    y = jax.random.normal(k1, (8, 2), dtype=jnp.float32)
    y_hat = jax.random.normal(k2, (8, 2), dtype=jnp.float32)

    l1, l2 = jax.block_until_ready(pitch_yaw_losses(y, y_hat))
    ref_l1 = _reference(y, y_hat, "l1")
    ref_l2 = _reference(y, y_hat, "l2")
    assert jnp.allclose(l1, ref_l1, rtol=1e-5, atol=1e-6), (l1, ref_l1)
    assert jnp.allclose(l2, ref_l2, rtol=1e-5, atol=1e-6), (l2, ref_l2)

    # Module-style forward path (single selected loss, static loss_type).
    sel = jax.block_until_ready(pitch_yaw_loss(y, y_hat, loss_type="l1"))
    assert jnp.allclose(sel, ref_l1, rtol=1e-5, atol=1e-6), (sel, ref_l1)

    # bf16 inputs: upcast happens inside the kernel.
    yb, yhb = y.astype(jnp.bfloat16), y_hat.astype(jnp.bfloat16)
    l1b, _ = jax.block_until_ready(pitch_yaw_losses(yb, yhb))
    ref_b = _reference(yb.astype(jnp.float32), yhb.astype(jnp.float32), "l1")
    assert jnp.allclose(l1b, ref_b, rtol=1e-3, atol=1e-3), (l1b, ref_b)

    # Larger batch exercising the multi-block reduction grid + tail masking.
    yl = jax.random.normal(k3, (70_001, 2), dtype=jnp.float32)
    yhl = jax.random.normal(k4, (70_001, 2), dtype=jnp.float32)
    L1, L2 = jax.block_until_ready(pitch_yaw_losses(yl, yhl))
    assert jnp.allclose(L1, _reference(yl, yhl, "l1"), rtol=1e-4, atol=1e-5)
    assert jnp.allclose(L2, _reference(yl, yhl, "l2"), rtol=1e-4, atol=1e-5)

    print("KERNEL_OK")
</pallas_src>

<mosaic_0001>
module attributes {stable_mosaic.version = 11 : i64} {
  func.func @_pitch_yaw_loss_kernel(%arg0: i32, %arg1: memref<1xi32, #tpu.memory_space<smem>>, %arg2: memref<1x128xf32, #tpu.memory_space<vmem>>, %arg3: memref<1x128xf32, #tpu.memory_space<vmem>>, %arg4: memref<2xf32, #tpu.memory_space<smem>>, %arg5: memref<8x128xf32, #tpu.memory_space<vmem>>, %arg6: memref<8x128xf32, #tpu.memory_space<vmem>>) attributes {dimension_semantics = [#tpu.dimension_semantics<arbitrary>], iteration_bounds = array<i64: 1>, scalar_prefetch = 1 : i64, scratch_operands = 2 : i64, tpu.core_type = #tpu.core_type<tc>, window_params = [{transform_indices = @transform_0, window_bounds = array<i64: 1, 128>}, {transform_indices = @transform_1, window_bounds = array<i64: 1, 128>}, {transform_indices = @transform_2, window_bounds = array<i64: 2>}]} {
    %c0_i32 = arith.constant 0 : i32
    %0 = arith.cmpi eq, %arg0, %c0_i32 : i32
    %1 = arith.extui %0 : i1 to i32
    %c0_i32_0 = arith.constant 0 : i32
    %2 = arith.cmpi ne, %1, %c0_i32_0 : i32
    scf.if %2 {
      %cst_17 = arith.constant 0.000000e+00 : f32
      %34 = vector.broadcast %cst_17 : f32 to vector<8x128xf32>
      %c0_18 = arith.constant 0 : index
      %c0_19 = arith.constant 0 : index
      %35 = vector.load %arg5[%c0_18, %c0_19] : memref<8x128xf32, #tpu.memory_space<vmem>>, vector<8x128xf32>
      tpu.vector_store %arg5[%c0_18, %c0_19], %34 {strides = array<i32>} : memref<8x128xf32, #tpu.memory_space<vmem>>, vector<8x128xf32>,
      %cst_20 = arith.constant 0.000000e+00 : f32
      %36 = vector.broadcast %cst_20 : f32 to vector<8x128xf32>
      %c0_21 = arith.constant 0 : index
      %c0_22 = arith.constant 0 : index
      %37 = vector.load %arg6[%c0_21, %c0_22] : memref<8x128xf32, #tpu.memory_space<vmem>>, vector<8x128xf32>
      tpu.vector_store %arg6[%c0_21, %c0_22], %36 {strides = array<i32>} : memref<8x128xf32, #tpu.memory_space<vmem>>, vector<8x128xf32>,
    } else {
    }
    %c0 = arith.constant 0 : index
    %c0_1 = arith.constant 0 : index
    %3 = vector.load %arg2[%c0, %c0_1] : memref<1x128xf32, #tpu.memory_space<vmem>>, vector<1x128xf32>
    %c0_2 = arith.constant 0 : index
    %c0_3 = arith.constant 0 : index
    %4 = vector.load %arg3[%c0_2, %c0_3] : memref<1x128xf32, #tpu.memory_space<vmem>>, vector<1x128xf32>
    %5 = arith.subf %3, %4 : vector<1x128xf32>
    %6 = tpu.iota {dimensions = array<i32: 0>} : vector<1x128xi32>
    %7 = tpu.iota {dimensions = array<i32: 1>} : vector<1x128xi32>
    %c1_i32 = arith.constant 1 : i32
    %8 = arith.muli %arg0, %c1_i32 : i32
    %9 = vector.broadcast %8 : i32 to vector<1x128xi32>
    %10 = arith.addi %9, %6 : vector<1x128xi32>
    %c128_i32 = arith.constant 128 : i32
    %11 = vector.broadcast %c128_i32 : i32 to vector<1x128xi32>
    %12 = arith.muli %10, %11 : vector<1x128xi32>
    %13 = arith.addi %12, %7 : vector<1x128xi32>
    %c0_4 = arith.constant 0 : index
    %14 = memref.load %arg1[%c0_4] : memref<1xi32, #tpu.memory_space<smem>>
    %15 = vector.broadcast %14 : i32 to vector<1x128xi32>
    %16 = arith.cmpi slt, %13, %15 : vector<1x128xi32>
    %cst = arith.constant 0.000000e+00 : f32
    %17 = vector.broadcast %cst : f32 to vector<1x128xf32>
    %18 = arith.select %16, %5, %17 : vector<1x128xi1>, vector<1x128xf32>
    %19 = math.absf %18 : vector<1x128xf32>
    %20 = arith.mulf %18, %18 : vector<1x128xf32>
    %c0_5 = arith.constant 0 : index
    %c0_6 = arith.constant 0 : index
    %21 = vector.load %arg5[%c0_5, %c0_6] : memref<8x128xf32, #tpu.memory_space<vmem>>, vector<1x128xf32>
    %cst_7 = arith.constant dense<0.000000e+00> : vector<128xf32>
    %22 = vector.multi_reduction <add>, %19, %cst_7 [0] : vector<1x128xf32> to vector<128xf32>
    %23 = vector.shape_cast %22 : vector<128xf32> to vector<1x128xf32>
    %24 = arith.addf %21, %23 : vector<1x128xf32>
    %c0_8 = arith.constant 0 : index
    %c0_9 = arith.constant 0 : index
    %25 = vector.load %arg5[%c0_8, %c0_9] : memref<8x128xf32, #tpu.memory_space<vmem>>, vector<1x128xf32>
    tpu.vector_store %arg5[%c0_8, %c0_9], %24 {strides = array<i32>} : memref<8x128xf32, #tpu.memory_space<vmem>>, vector<1x128xf32>,
    %c0_10 = arith.constant 0 : index
    %c0_11 = arith.constant 0 : index
    %26 = vector.load %arg6[%c0_10, %c0_11] : memref<8x128xf32, #tpu.memory_space<vmem>>, vector<1x128xf32>
    %cst_12 = arith.constant dense<0.000000e+00> : vector<128xf32>
    %27 = vector.multi_reduction <add>, %20, %cst_12 [0] : vector<1x128xf32> to vector<128xf32>
    %28 = vector.shape_cast %27 : vector<128xf32> to vector<1x128xf32>
    %29 = arith.addf %26, %28 : vector<1x128xf32>
    %c0_13 = arith.constant 0 : index
    %c0_14 = arith.constant 0 : index
    %30 = vector.load %arg6[%c0_13, %c0_14] : memref<8x128xf32, #tpu.memory_space<vmem>>, vector<1x128xf32>
    tpu.vector_store %arg6[%c0_13, %c0_14], %29 {strides = array<i32>} : memref<8x128xf32, #tpu.memory_space<vmem>>, vector<1x128xf32>,
    %c0_i32_15 = arith.constant 0 : i32
    %31 = arith.cmpi eq, %arg0, %c0_i32_15 : i32
    %32 = arith.extui %31 : i1 to i32
    %c0_i32_16 = arith.constant 0 : i32
    %33 = arith.cmpi ne, %32, %c0_i32_16 : i32
    scf.if %33 {
      %c0_17 = arith.constant 0 : index
      %34 = memref.load %arg1[%c0_17] : memref<1xi32, #tpu.memory_space<smem>>
      %35 = arith.sitofp %34 : i32 to f32
      %c0_18 = arith.constant 0 : index
      %c0_19 = arith.constant 0 : index
      %36 = vector.load %arg5[%c0_18, %c0_19] : memref<8x128xf32, #tpu.memory_space<vmem>>, vector<8x128xf32>
      %37 = vector.broadcast %35 : f32 to vector<8x128xf32>
      %38 = arith.divf %36, %37 : vector<8x128xf32>
      %39 = vector.shape_cast %38 : vector<8x128xf32> to vector<1x8x128xf32>
      %cst_20 = arith.constant dense<0.000000e+00> : vector<1xf32>
      %40 = vector.multi_reduction <add>, %39, %cst_20 [1, 2] : vector<1x8x128xf32> to vector<1xf32>
      %41 = vector.shape_cast %40 : vector<1xf32> to vector<1x1x1xf32>
      %42 = vector.extract %41[0, 0, 0] : f32 from vector<1x1x1xf32>
      %c0_21 = arith.constant 0 : index
      %43 = memref.load %arg4[%c0_21] : memref<2xf32, #tpu.memory_space<smem>>
      memref.store %42, %arg4[%c0_21] : memref<2xf32, #tpu.memory_space<smem>>
      %c0_22 = arith.constant 0 : index
      %c0_23 = arith.constant 0 : index
      %44 = vector.load %arg6[%c0_22, %c0_23] : memref<8x128xf32, #tpu.memory_space<vmem>>, vector<8x128xf32>
      %45 = vector.broadcast %35 : f32 to vector<8x128xf32>
      %46 = arith.divf %44, %45 : vector<8x128xf32>
      %47 = vector.shape_cast %46 : vector<8x128xf32> to vector<1x8x128xf32>
      %cst_24 = arith.constant dense<0.000000e+00> : vector<1xf32>
      %48 = vector.multi_reduction <add>, %47, %cst_24 [1, 2] : vector<1x8x128xf32> to vector<1xf32>
      %49 = vector.shape_cast %48 : vector<1xf32> to vector<1x1x1xf32>
      %50 = vector.extract %49[0, 0, 0] : f32 from vector<1x1x1xf32>
      %c1 = arith.constant 1 : index
      %51 = memref.load %arg4[%c1] : memref<2xf32, #tpu.memory_space<smem>>
      memref.store %50, %arg4[%c1] : memref<2xf32, #tpu.memory_space<smem>>
    } else {
    }
    return
  }
  func.func @transform_0(%arg0: i32, %arg1: memref<1xi32, #tpu.memory_space<smem>>) -> (i32, i32) {
    %c0_i32 = arith.constant 0 : i32
    %c0_i32_0 = arith.constant 0 : i32
    return %arg0, %c0_i32 : i32, i32
  }
  func.func @transform_1(%arg0: i32, %arg1: memref<1xi32, #tpu.memory_space<smem>>) -> (i32, i32) {
    %c0_i32 = arith.constant 0 : i32
    %c0_i32_0 = arith.constant 0 : i32
    return %arg0, %c0_i32 : i32, i32
  }
  func.func @transform_2(%arg0: i32, %arg1: memref<1xi32, #tpu.memory_space<smem>>) -> i32 {
    %c0_i32 = arith.constant 0 : i32
    %c0_i32_0 = arith.constant 0 : i32
    return %c0_i32 : i32
  }
}

</mosaic_0001>

<bundles_post_ra>
// kernel: pitch_yaw_losses.1
= control target key start
LH: loop header
LB: loop body
LE: loop exit
PB: predicated region body
PF: predicated region fallthrough
CT: control target
= control target key end

     0   :  { %v23_v0 = vlaneseq  ;;  %v128_v1 = vmov 0.0   ;;  %s165_s0 = inlined_call_operand.<no memory space> [shape: s32[1], index: 0, kind: input, shape index: {}]   ;;  %s166_s1 = inlined_call_operand.vmem [shape: f32[1,128], index: 1, kind: input, shape index: {}]   ;;  %s167_s2 = inlined_call_operand.vmem [shape: f32[1,128], index: 2, kind: input, shape index: {}]   ;;  %s168_s3 = inlined_call_operand.vmem [shape: f32[2], index: 3, kind: output, shape index: {}]  }
   0x1   :  { %s49_s14 = scvt.s32.f32 %s165_s0  ;;  %18 = vst [vmem:[#allocation2] sm:$0xff] %v128_v1  ;;  %v20_v2 = vld [vmem:[%s166_s1] sm:$0x1] }
   0x2   :  { %9 = vsyncpa [#allocation7], 0  ;;  %v21_v3 = vld [vmem:[%s167_s2] sm:$0x1]  ;;  %v24_v4 = vshrl.u32 %v23_v0, 7  ;;  %v26_v5 = vand.u32 127, %v23_v0  ;;  %v32_v9 = vstv %s165_s0 }
   0x3   :  { %v51_v6 = vstv %s49_s14  ;;  %19 = vst [vmem:[#allocation3] sm:$0xff] %v128_v1  ;;  %v22_v8 = vsub.f32 %v20_v2, %v21_v3  ;;  %s96_s21 = sshll.u32 %s168_s3, 4  ;;  %s129_s23 = smov [#allocation6]   ;;  %s97_s21 = int_to_ptr.vmem [resolvable:$true] %s96_s21 }
   0x4   :  { %112 = vrcp.f32 %v51_v6  ;;  %v29_v7 = vmul.u32 128, %v24_v4  ;;  %vm57_vm1 = vweird.f32 %v51_v6  ;;  %v61_v18 = vand.u32 2147483647, %v51_v6 }
   0x5   :  { %v63_v19 = vand.u32 2147483648, %v51_v6 }
   0x6   :  { %v30_v10 = vadd.s32 %v29_v7, %v26_v5  ;;  %vm62_vm4 = vcmp.eq.f32.partialorder %v61_v18, 8.507059e+37 }
   0x7   :  { %v64_v24 = vor.u32 1.1754944e-38, %v63_v19 }
   0x8   :  { %vm33_vm0 = vcmp.lt.s32.totalorder %v30_v10, %v32_v9  ;;  %v37_v13 = vld [vmem:[#allocation2] sm:$0x1] }
   0x9   :  { %v34_v12 = vsel %vm33_vm0, %v22_v8, 0.0 }
   0xa   :  { %v113_v11 = vpop.eup %112  ;;  %v41_v14 = vld [vmem:[#allocation3] sm:$0x1]  ;;  %v35_v15 = vand.u32 2147483647, %v34_v12  ;;  %v36_v17 = vmul.f32 %v34_v12, %v34_v12 }
   0xb   :  { %v53_v16 = vmul.f32 %v113_v11, %v51_v6  ;;  %vm58_vm2 = vweird.f32 %v113_v11 }
   0xc   :  { %v39_v20 = vadd.f32 %v37_v13, %v35_v15  ;;  %v43_v22 = vadd.f32 %v41_v14, %v36_v17  ;;  %vm59_vm3 = vmor %vm57_vm1, %vm58_vm2 }
   0xd   :  { %v54_v21 = vsub.f32 1.0, %v53_v16 }
   0xe   :  { %40 = vst [vmem:[#allocation2] sm:$0x1] %v39_v20 }
   0xf   :  { %v55_v23 = vmul.f32 %v113_v11, %v54_v21  ;;  %44 = vst [vmem:[#allocation3] sm:$0x1] %v43_v22 }
  0x11   :  { %v56_v25 = vadd.f32 %v113_v11, %v55_v23 }
  0x13   :  { %v60_v26 = vsel %vm59_vm3, %v113_v11, %v56_v25 }
  0x14   :  { %v65_v27 = vsel %vm62_vm4, %v64_v24, %v60_v26 }
  0x15   :  { %v50_v28 = vld [vmem:[#allocation2] sm:$0xff] }
  0x16   :  { %v66_v29 = vmul.f32 %v65_v27, %v50_v28  ;;  %v78_v30 = vld [vmem:[#allocation3] sm:$0xff] }
  0x17   :  { %v79_v31 = vmul.f32 %v78_v30, %v65_v27 }
  0x18   :  { %67 = vadd.xlane.f32.xlu0 %v66_v29 }
  0x20   :  { %80 = vadd.xlane.f32.xlu0 %v79_v31 }
  0x8b   :  { %v68_v32 = vpop.xlane.xlu0 %67 }
  0x8c   :  { %v69_v33 = vrot.slane %v68_v32, 4 }
  0x8e   :  { %v70_v34 = vadd.f32 %v69_v33, %v68_v32 }
  0x90   :  { %v71_v35 = vrot.slane %v70_v34, 2 }
  0x92   :  { %v72_v36 = vadd.f32 %v71_v35, %v70_v34 }
  0x93   :  { %v81_v37 = vpop.xlane.xlu0 %80 }
  0x94   :  { %v82_v38 = vrot.slane %v81_v37, 4  ;;  %v73_v39 = vrot.slane %v72_v36, 1 }
  0x96   :  { %v83_v40 = vadd.f32 %v82_v38, %v81_v37  ;;  %v74_v41 = vadd.f32 %v73_v39, %v72_v36 }
  0x98   :  { %v84_v42 = vrot.slane %v83_v40, 2  ;;  %106 = vpush %v74_v41 }
  0x9a   :  { %v85_v43 = vadd.f32 %v84_v42, %v83_v40 }
  0x9c   :  { %v86_v44 = vrot.slane %v85_v43, 1 }
  0x9e   :  { %v87_v45 = vadd.f32 %v86_v44, %v85_v43 }
  0xa0   :  { %108 = vpush %v87_v45 }
  0xc9   :  { %s107_s0 = spop %106 }
  0xca   :  { %77 = sst [smem:[#allocation6]] %s107_s0 }
  0xd1   :  { %s109_s22 = spop %108 }
  0xd2   :  { %90 = sst [smem:[#allocation6 + $0x1]] %s109_s22 }
  0xd3   :  { %99 = dma.smem_to_vmem %s129_s23, 16, %s97_s21, [#allocation7]  }
  0xd4   :  { %126 = dma.done.wait [#allocation7], 16  }
  0xd5   :  { %127 = vsyncadd [#allocation7], 4294967280 }
  0xd6   :  { %104 = sfence }
  0xd7   :  { %105 = vsyncpa [#allocation7], 1 }

</bundles_post_ra>
